<compile_context>
chip_gen: v6e
topology: v6e:2x2x1
jax: 0.10.0
libtpu: 0.0.40
codegen_flags: <defaults>
</compile_context>

<pallas_src>
import jax
import jax.numpy as jnp
from jax.experimental import pallas as pl
from jax.experimental.pallas import tpu as pltpu

_HIDDEN = 256


def generator_kernel(x_ref, w1_ref, b1_ref, w2_ref, b2_ref, o_ref):
    # First linear: bf16 x bf16 -> f32 accumulate on the MXU.
    h = jnp.dot(x_ref[...], w1_ref[...], preferred_element_type=jnp.float32)
    # Bias + ReLU in f32 (VPU).
    h = jnp.maximum(h + b1_ref[...], 0.0)
    # Second linear: downcast activations to bf16 for the MXU, accumulate f32.
    y = jnp.dot(h.astype(w2_ref.dtype), w2_ref[...],
                preferred_element_type=jnp.float32)
    # Bias + tanh in f32 (tanh goes to the EUP); cast only at the store.
    o_ref[...] = jnp.tanh(y + b2_ref[...]).astype(o_ref.dtype)


def _num_tensorcores_per_chip():
    """Best-effort count of TensorCores behind one JAX device."""
    try:
        kind = jax.devices()[0].device_kind.lower()
    except Exception:  # pragma: no cover - defensive
        return 1
    if "v7" in kind or "7x" in kind or "v4" in kind or "v5p" in kind:
        return 2
    return 1


def _pick_tile_b(B, in_dim, hidden, out_dim, n_tc):
    """MXU-aligned, VMEM-budgeted batch tile.

    Per-row VMEM estimate: double-buffered bf16 x tile + double-buffered output
    tile (counted at 4 B/elem to be safe) + f32 hidden activations (+ bf16 copy)
    + f32 pre-tanh row.  Cap at 4096 rows; 256-aligned tiles keep the (8,128)
    layout rule satisfied and match the MXU on every chip generation.
    """
    row_bytes = (2 * (2 * in_dim)          # x tile, bf16, double-buffered
                 + 2 * (4 * out_dim)       # out tile (<= f32), double-buffered
                 + 4 * hidden + 2 * hidden  # f32 hidden + bf16 recast
                 + 4 * out_dim)            # f32 pre-tanh
    budget = 20 * 1024 * 1024              # headroom under the 32 MiB scoped limit
    cap = (budget // max(row_bytes, 1)) // 256 * 256
    cap = max(256, min(cap, 4096))
    if n_tc >= 2 and B > 256:
        # Guarantee >= 2 grid steps so ("parallel",) shards batch across TCs.
        return min(cap, max(256, (B // 2) // 256 * 256))
    # Single TensorCore (v5e/v6e) or tiny batch: fewest, largest blocks.
    return B if B <= cap else cap


def generator_forward(x, w1, b1, w2, b2, *, tile_b=None, out_dtype=jnp.bfloat16):
    """x: (B, input_size) -> (B, output_size) = Tanh(ReLU(x@W1+b1)@W2+b2).

    Weights are stored transposed vs. PyTorch: W1 (in, 256), W2 (256, out).
    Biases may be 1-D (PyTorch style) or (1, dim).  Output dtype defaults to
    bf16 (tanh output is in [-1,1]); pass out_dtype=jnp.float32 if needed.
    """
    B, in_dim = x.shape
    hidden = w1.shape[1]
    out_dim = w2.shape[1]

    # Normalize bias shapes (accept (dim,) or (1, dim)).
    b1 = jnp.reshape(b1, (1, hidden))
    b2 = jnp.reshape(b2, (1, out_dim))

    # bf16 MXU inputs (f32 accumulation inside the kernel); biases stay f32.
    x_bf = x.astype(jnp.bfloat16)
    w1_bf = w1.astype(jnp.bfloat16)
    w2_bf = w2.astype(jnp.bfloat16)
    b1_f32 = b1.astype(jnp.float32)
    b2_f32 = b2.astype(jnp.float32)

    if tile_b is None:
        tile_b = _pick_tile_b(B, in_dim, hidden, out_dim,
                              _num_tensorcores_per_chip())
    grid = (pl.cdiv(B, tile_b),)

    out_itemsize = jnp.finfo(out_dtype).bits // 8
    cost = pl.CostEstimate(
        flops=2 * B * (in_dim * hidden + hidden * out_dim),
        transcendentals=B * out_dim,
        bytes_accessed=(x_bf.size * 2 + w1_bf.size * 2 + w2_bf.size * 2
                        + b1_f32.size * 4 + b2_f32.size * 4
                        + B * out_dim * out_itemsize),
    )

    out = pl.pallas_call(
        generator_kernel,
        out_shape=jax.ShapeDtypeStruct((B, out_dim), out_dtype),
        grid_spec=pltpu.PrefetchScalarGridSpec(
            num_scalar_prefetch=0,
            grid=grid,
            in_specs=[
                pl.BlockSpec((tile_b, in_dim), lambda i: (i, 0)),    # x tile
                pl.BlockSpec((in_dim, hidden), lambda i: (0, 0)),    # W1 (resident)
                pl.BlockSpec((1, hidden), lambda i: (0, 0)),         # b1 (resident)
                pl.BlockSpec((hidden, out_dim), lambda i: (0, 0)),   # W2 (resident)
                pl.BlockSpec((1, out_dim), lambda i: (0, 0)),        # b2 (resident)
            ],
            # Full-extent out_dim block: no padding, no post-kernel slice pass.
            out_specs=pl.BlockSpec((tile_b, out_dim), lambda i: (i, 0)),
        ),
        compiler_params=pltpu.CompilerParams(
            dimension_semantics=("parallel",),
            vmem_limit_bytes=32 * 1024 * 1024,
        ),
        cost_estimate=cost,
    )(x_bf, w1_bf, b1_f32, w2_bf, b2_f32)
    return out


def init_generator_params(key, input_size, output_size, hidden=_HIDDEN,
                          dtype=jnp.float32):
    """Deterministic init mirroring PyTorch nn.Linear default:
    U(-1/sqrt(fan_in), 1/sqrt(fan_in)).  Weights stored as (in, out)."""
    k1, k2, k3, k4 = jax.random.split(key, 4)
    bound1 = 1.0 / jnp.sqrt(input_size)
    bound2 = 1.0 / jnp.sqrt(hidden)
    w1 = jax.random.uniform(k1, (input_size, hidden), dtype, -bound1, bound1)
    b1 = jax.random.uniform(k2, (1, hidden), dtype, -bound1, bound1)
    w2 = jax.random.uniform(k3, (hidden, output_size), dtype, -bound2, bound2)
    b2 = jax.random.uniform(k4, (1, output_size), dtype, -bound2, bound2)
    return w1, b1, w2, b2


if __name__ == "__main__":
    key = jax.random.PRNGKey(0)
    kx, kp = jax.random.split(key)

    batch = 8
    input_size = 32     # latent dim fed to the generator
    output_size = 64    # generated sample dim

    x = jax.random.normal(kx, (batch, input_size), dtype=jnp.float32)
    w1, b1, w2, b2 = init_generator_params(kp, input_size, output_size)

    out = generator_forward(x, w1, b1, w2, b2)
    out = jax.block_until_ready(out)

    # Pure-JAX f32 reference; tolerance covers the bf16 MXU path + bf16 output.
    ref = jnp.tanh(jnp.maximum(x @ w1 + b1, 0.0) @ w2 + b2)
    assert out.shape == (batch, output_size)
    assert out.dtype == jnp.bfloat16
    err = float(jnp.max(jnp.abs(out.astype(jnp.float32) - ref)))
    assert err < 3e-2, err

    print("KERNEL_OK")
</pallas_src>

<mosaic_0001>
module attributes {stable_mosaic.version = 11 : i64} {
  func.func @generator_kernel(%arg0: i32, %arg1: memref<8x32xbf16, #tpu.memory_space<vmem>>, %arg2: memref<32x256xbf16, #tpu.memory_space<vmem>>, %arg3: memref<1x256xf32, #tpu.memory_space<vmem>>, %arg4: memref<256x64xbf16, #tpu.memory_space<vmem>>, %arg5: memref<1x64xf32, #tpu.memory_space<vmem>>, %arg6: memref<8x64xbf16, #tpu.memory_space<vmem>>) attributes {dimension_semantics = [#tpu.dimension_semantics<parallel>], iteration_bounds = array<i64: 1>, scalar_prefetch = 0 : i64, scratch_operands = 0 : i64, tpu.core_type = #tpu.core_type<tc>, window_params = [{transform_indices = @transform_0, window_bounds = array<i64: 8, 32>}, {pipeline_mode = #tpu.pipeline_mode<synchronous>, transform_indices = @transform_1, window_bounds = array<i64: 32, 256>}, {pipeline_mode = #tpu.pipeline_mode<synchronous>, transform_indices = @transform_2, window_bounds = array<i64: 1, 256>}, {pipeline_mode = #tpu.pipeline_mode<synchronous>, transform_indices = @transform_3, window_bounds = array<i64: 256, 64>}, {pipeline_mode = #tpu.pipeline_mode<synchronous>, transform_indices = @transform_4, window_bounds = array<i64: 1, 64>}, {transform_indices = @transform_5, window_bounds = array<i64: 8, 64>}]} {
    %c0 = arith.constant 0 : index
    %c0_0 = arith.constant 0 : index
    %0 = vector.load %arg1[%c0, %c0_0] : memref<8x32xbf16, #tpu.memory_space<vmem>>, vector<8x32xbf16>
    %c0_1 = arith.constant 0 : index
    %c0_2 = arith.constant 0 : index
    %1 = vector.load %arg2[%c0_1, %c0_2] : memref<32x256xbf16, #tpu.memory_space<vmem>>, vector<32x256xbf16>
    %cst = arith.constant dense<0.000000e+00> : vector<8x256xf32>
    %2 = tpu.matmul %0, %1, %cst {dimension_numbers = #tpu.dot_dimension_numbers<[1], [0], [0], [1], [0, 0, 1, 1], [], []>} : vector<8x32xbf16>, vector<32x256xbf16>, vector<8x256xf32> -> vector<8x256xf32>
    %c0_3 = arith.constant 0 : index
    %c0_4 = arith.constant 0 : index
    %3 = vector.load %arg3[%c0_3, %c0_4] : memref<1x256xf32, #tpu.memory_space<vmem>>, vector<1x256xf32>
    %4 = vector.broadcast %3 : vector<1x256xf32> to vector<8x256xf32>
    %5 = arith.addf %2, %4 : vector<8x256xf32>
    %cst_5 = arith.constant 0.000000e+00 : f32
    %6 = vector.broadcast %cst_5 : f32 to vector<8x256xf32>
    %7 = arith.maximumf %5, %6 : vector<8x256xf32>
    %8 = arith.truncf %7 : vector<8x256xf32> to vector<8x256xbf16>
    %c0_6 = arith.constant 0 : index
    %c0_7 = arith.constant 0 : index
    %9 = vector.load %arg4[%c0_6, %c0_7] : memref<256x64xbf16, #tpu.memory_space<vmem>>, vector<256x64xbf16>
    %cst_8 = arith.constant dense<0.000000e+00> : vector<8x64xf32>
    %10 = tpu.matmul %8, %9, %cst_8 {dimension_numbers = #tpu.dot_dimension_numbers<[1], [0], [0], [1], [0, 0, 1, 1], [], []>} : vector<8x256xbf16>, vector<256x64xbf16>, vector<8x64xf32> -> vector<8x64xf32>
    %c0_9 = arith.constant 0 : index
    %c0_10 = arith.constant 0 : index
    %11 = vector.load %arg5[%c0_9, %c0_10] : memref<1x64xf32, #tpu.memory_space<vmem>>, vector<1x64xf32>
    %12 = vector.broadcast %11 : vector<1x64xf32> to vector<8x64xf32>
    %13 = arith.addf %10, %12 : vector<8x64xf32>
    %14 = math.tanh %13 : vector<8x64xf32>
    %15 = arith.truncf %14 : vector<8x64xf32> to vector<8x64xbf16>
    %c0_11 = arith.constant 0 : index
    %c0_12 = arith.constant 0 : index
    %16 = vector.load %arg6[%c0_11, %c0_12] : memref<8x64xbf16, #tpu.memory_space<vmem>>, vector<8x64xbf16>
    tpu.vector_store %arg6[%c0_11, %c0_12], %15 {strides = array<i32>} : memref<8x64xbf16, #tpu.memory_space<vmem>>, vector<8x64xbf16>,
    return
  }
  func.func @transform_0(%arg0: i32) -> (i32, i32) {
    %c0_i32 = arith.constant 0 : i32
    %c0_i32_0 = arith.constant 0 : i32
    return %arg0, %c0_i32 : i32, i32
  }
  func.func @transform_1(%arg0: i32) -> (i32, i32) {
    %c0_i32 = arith.constant 0 : i32
    %c0_i32_0 = arith.constant 0 : i32
    %c0_i32_1 = arith.constant 0 : i32
    return %c0_i32, %c0_i32_0 : i32, i32
  }
  func.func @transform_2(%arg0: i32) -> (i32, i32) {
    %c0_i32 = arith.constant 0 : i32
    %c0_i32_0 = arith.constant 0 : i32
    %c0_i32_1 = arith.constant 0 : i32
    return %c0_i32, %c0_i32_0 : i32, i32
  }
  func.func @transform_3(%arg0: i32) -> (i32, i32) {
    %c0_i32 = arith.constant 0 : i32
    %c0_i32_0 = arith.constant 0 : i32
    %c0_i32_1 = arith.constant 0 : i32
    return %c0_i32, %c0_i32_0 : i32, i32
  }
  func.func @transform_4(%arg0: i32) -> (i32, i32) {
    %c0_i32 = arith.constant 0 : i32
    %c0_i32_0 = arith.constant 0 : i32
    %c0_i32_1 = arith.constant 0 : i32
    return %c0_i32, %c0_i32_0 : i32, i32
  }
  func.func @transform_5(%arg0: i32) -> (i32, i32) {
    %c0_i32 = arith.constant 0 : i32
    %c0_i32_0 = arith.constant 0 : i32
    return %arg0, %c0_i32 : i32, i32
  }
}

</mosaic_0001>

<bundles_post_ra>
// kernel: tpu_custom_call.1
= control target key start
LH: loop header
LB: loop body
LE: loop exit
PB: predicated region body
PF: predicated region fallthrough
CT: control target
= control target key end

     0   :  { %v393_v2 = vmov 0   ;;  %vm59_vm0 = vcmask 261120   ;;  %s497_s0 = inlined_call_operand.vmem [shape: bf16[8,32], index: 0, kind: input, shape index: {}]   ;;  %s498_s1 = inlined_call_operand.vmem [shape: bf16[32,256], index: 1, kind: input, shape index: {}]   ;;  %s499_s2 = inlined_call_operand.vmem [shape: f32[1,256], index: 2, kind: input, shape index: {}]   ;;  %s500_s3 = inlined_call_operand.vmem [shape: bf16[256,64], index: 3, kind: input, shape index: {}]   ;;  %s501_s4 = inlined_call_operand.vmem [shape: f32[1,64], index: 4, kind: input, shape index: {}]   ;;  %s502_s5 = inlined_call_operand.hbm [shape: bf16[8,64], index: 5, kind: output, shape index: {}]  }
   0x1   :  { %v347_v0 = vld [vmem:[%s498_s1 + $0x14] ss:$8 sps:$4 sm:$0xff]   ;;  %v349_v1 = vld [vmem:[%s498_s1 + $0x10] ss:$8 sps:$4 sm:$0xff]   ;;  %95 = vmatprep.mubr.bf16.mxu0 %v393_v2  ;;  %v350_v3 = vld [vmem:[%s498_s1 + $0x4] ss:$8 sps:$4 sm:$0xff]  }
   0x2   :  { %75 = vmatprep.subr.bf16.mxu0 %v347_v0  ;;  %v352_v4 = vld [vmem:[%s498_s1] ss:$8 sps:$4 sm:$0xff]   ;;  %v353_v5 = vld [vmem:[%s500_s3 + $0x78] sm:$0xff]   ;;  %v355_v8 = vld [vmem:[%s500_s3 + $0x70] sm:$0xff]  }
   0x3   :  { %76 = vmatpush1.bf16.msra.mxu0 %v349_v1  ;;  %v354_v6 = vld [vmem:[%s500_s3 + $0x38] sm:$0xff]   ;;  %v22_v7 = vld [vmem:[%s497_s0] sm:$0xf]  ;;  %323 = vmatprep.subr.bf16.mxu1 %v353_v5  ;;  %v356_v9 = vld [vmem:[%s500_s3 + $0x30] sm:$0xff]  }
   0x4   :  { %77 = vmatprep.subr.bf16.mxu0 %v350_v3  ;;  %324 = vmatpush3.bf16.msra.mxu1 %v354_v6  ;;  %v357_v10 = vld [vmem:[%s500_s3 + $0x68] sm:$0xff]   ;;  %v359_v12 = vld [vmem:[%s500_s3 + $0x60] sm:$0xff]   ;;  %v361_v14 = vld [vmem:[%s500_s3 + $0x58] sm:$0xff]  }
   0x5   :  { %325 = vmatprep.subr.bf16.mxu1 %v355_v8  ;;  %v358_v11 = vld [vmem:[%s500_s3 + $0x28] sm:$0xff]   ;;  %v360_v13 = vld [vmem:[%s500_s3 + $0x20] sm:$0xff]   ;;  %v362_v15 = vld [vmem:[%s500_s3 + $0x18] sm:$0xff]  }
   0x7   :  { %78 = vmatpush1.bf16.msra.mxu0 %v352_v4 }
   0x8   :  { %326 = vmatpush3.bf16.msra.mxu1 %v356_v9 }
   0x9   :  { %327 = vmatprep.subr.bf16.mxu1 %v357_v10 }
   0xa   :  { %305 = vmatmul.mubr.msk.bf16.vlgmr.msra.gmra.mxu0 %vm59_vm0, %v22_v7 }
   0xc   :  { %328 = vmatpush3.bf16.msra.mxu1 %v358_v11 }
   0xd   :  { %329 = vmatprep.subr.bf16.mxu1 %v359_v12 }
  0x10   :  { %330 = vmatpush3.bf16.msra.mxu1 %v360_v13 }
  0x11   :  { %10 = vsyncpa [#allocation3], 0  ;;  %331 = vmatprep.subr.bf16.mxu1 %v361_v14  ;;  %v363_v16 = vld [vmem:[%s500_s3 + $0x50] sm:$0xff]   ;;  %v365_v18 = vld [vmem:[%s500_s3 + $0x48] sm:$0xff]   ;;  %v29_v22 = vlaneseq  ;;  %vm285_vm1 = vcmask 519168  }
  0x12   :  { %v364_v17 = vld [vmem:[%s500_s3 + $0x10] sm:$0xff]   ;;  %v366_v19 = vld [vmem:[%s500_s3 + $0x8] sm:$0xff]   ;;  %v367_v20 = vld [vmem:[%s500_s3 + $0x40] sm:$0xff]  }
  0x13   :  { %v368_v21 = vld [vmem:[%s500_s3] sm:$0xff]   ;;  %v30_v23 = vshrl.u32 %v29_v22, 7 }
  0x14   :  { %332 = vmatpush3.bf16.msra.mxu1 %v362_v15  ;;  %v27_v25 = vld [vmem:[%s499_s2] sm:$0x3]  ;;  %s394_s2 = smov [#allocation2]  }
  0x15   :  { %333 = vmatprep.subr.bf16.mxu1 %v363_v16  ;;  %v31_v24 = vsub.s32 0, %v30_v23  ;;  %v35_v26 = vsub.s32 1, %v30_v23  ;;  %v306_v40 = vld [vmem:[%s501_s4] ss:$0 sm:$0xff]  ;;  %s293_s10 = sshll.u32 %s394_s2, 4  ;;  %s294_s10 = int_to_ptr.vmem [resolvable:$true] %s293_s10 }
  0x16   :  { %s371_s11 = scalar_lea.vmem %s294_s10, 64  ;;  %p376_p1 = scmp.lt.s32.totalorder %s294_s10, %s294_s10 }
  0x17   :  { %v32_v27 = vrot.slane %v27_v25, %v31_v24  ;;  %v36_v28 = vrot.slane %v27_v25, %v35_v26  ;;  %p372_p0 = scmp.ne.s32.totalorder %s294_s10, %s371_s11  ;;  %p377_p2 = scmp.lt.s32.totalorder %s371_s11, %s371_s11 }
  0x18   :  { %334 = vmatpush3.bf16.msra.mxu1 %v364_v17 }
  0x19   :  { %335 = vmatprep.subr.bf16.mxu1 %v365_v18  ;;  %p378_p3 = por %p377_p2, %p376_p1 }
  0x1b   :  { %p379_p4 = pnand %p378_p3, %p372_p0 }
  0x1c   :  { %336 = vmatpush3.bf16.msra.mxu1 %v366_v19 }
  0x1d   :  { %337 = vmatprep.subr.bf16.mxu1 %v367_v20 }
  0x20   :  { %338 = vmatpush3.bf16.msra.mxu1 %v368_v21 }
  0xca   :  { %v97_v29 = vpop.f32.mrf.mxu0 }
  0xcb   :  { %v98_v30 = vadd.f32 %v97_v29, %v32_v27 }
  0xcc   :  { %v99_v31 = vpop.f32.mrf.mxu0 }
  0xcd   :  { %v100_v32 = vadd.f32 %v99_v31, %v36_v28  ;;  %v104_v33 = vmax.f32 %v98_v30, 0.0 }
  0xce   :  { %v101_v34 = vpop.f32.mrf.mxu0 }
  0xcf   :  { %v105_v35 = vmax.f32 %v100_v32, 0.0  ;;  %v106_v38 = vpack.c.bf16 %v104_v33, %v104_v33 }
  0xd0   :  { %v102_v36 = vpop.f32.mrf.mxu0 }
  0xd1   :  { %v107_v37 = vpack.c.bf16 %v105_v35, %v105_v35 }
  0xd3   :  { %275 = vmatprep.mubr.bf16.mxu1 %v107_v37 }
  0xd4   :  { %276 = vmatmul.mubr.bf16.vlgmr.msra.gmra.mxu1 %v106_v38 }
 0x194   :  { %v339_v39 = vpop.f32.mrf.mxu1 }
 0x196   :  { %v340_v41 = vpop.f32.mrf.mxu1 }
 0x197   :  { %v341_v42 = vadd.f32 %v340_v41, %v339_v39 }
 0x198   :  { %v342_v43 = vpop.f32.mrf.mxu1 }
 0x199   :  { %v278_v44 = vadd.f32 %v341_v42, %v306_v40 }
 0x19a   :  { %v343_v45 = vpop.f32.mrf.mxu1 }
 0x19b   :  { %369 = vtanh.f32 %v278_v44 }
 0x1a8   :  { %v370_v46 = vpop.eup %369 }
 0x1a9   :  { %v284_v47 = vpack.c.bf16 %v370_v46, %v370_v46 }
 0x1ab   :  { %286 = vst.msk [vmem:[#allocation2] sm:$0xf] %vm285_vm1, %v284_v47 }
 0x1ac   :  { %382 = shalt.err (!%p379_p4)
}
 0x1ad   :  { %296 = dma.vmem_to_hbm [thread:$0]  %s294_s10, 64, %s502_s5, [#allocation3]  }
 0x1ae   :  { %391 = dma.done.wait [#allocation3], 64  }
 0x1af   :  { %392 = vsyncadd [#allocation3], 4294967232 }
 0x1b0   :  { %300 = vsyncpa [#allocation3], 1 }

</bundles_post_ra>
